<compile_context>
chip_gen: v7x
topology: tpu7x:2x2x1
jax: 0.10.0
libtpu: 0.0.40
codegen_flags: <defaults>
</compile_context>

<pallas_src>
import functools

import jax
import jax.numpy as jnp
from jax.experimental import pallas as pl
from jax.experimental.pallas import tpu as pltpu


def _dice_kernel(x_ref, t_ref, out_ref, inter_acc, union_acc, *,
                 smooth, hw_valid, need_mask):
    """Grid = (batch n, spatial chunk c).

    x_ref:     (1, C, BR, 128) logits (native dtype)
    t_ref:     (1, BR, 128)    int32 class ids (pad tail = -1 when padded)
    out_ref:   (1, 1, 128)     f32 per-sample sum_c(1 - dice_c), splat over lanes
    inter_acc: (C, 128)        f32 scratch — per-class intersection partials
    union_acc: (C, 128)        f32 scratch — per-class union partials
    """
    c_idx = pl.program_id(1)
    n_chunks = pl.num_programs(1)

    @pl.when(c_idx == 0)
    def _():
        inter_acc[...] = jnp.zeros_like(inter_acc)
        union_acc[...] = jnp.zeros_like(union_acc)

    C = x_ref.shape[1]
    BR = x_ref.shape[2]

    t = t_ref[0]                                            # (BR, 128) int32
    if need_mask:
        # Validity mask covers both the 128-alignment pad tail and any garbage
        # rows of a ragged last block.  jnp.where (not a multiplicative mask)
        # keeps everything NaN/Inf-safe against undefined block tails.
        row = jax.lax.broadcasted_iota(jnp.int32, (BR, 128), 0)
        lane = jax.lax.broadcasted_iota(jnp.int32, (BR, 128), 1)
        pix = (c_idx * BR + row) * 128 + lane
        valid = pix < hw_valid
        valid_f = valid.astype(jnp.float32)
        t = jnp.where(valid, t, -1)                         # -1 never matches a class

    # Streaming channel softmax over C slabs: only the exp slabs (one C-sized
    # f32 tensor) stay live; everything else is (BR,128)-sized VPU/EUP work.
    xs = []
    for c in range(C):
        xc = x_ref[0, c].astype(jnp.float32)                # (BR, 128)
        if need_mask:
            xc = jnp.where(valid, xc, 0.0)                  # finite logits in tail
        xs.append(xc)
    m = xs[0]
    for c in range(1, C):
        m = jnp.maximum(m, xs[c])
    es = [jnp.exp(xs[c] - m) for c in range(C)]
    s = es[0]
    for c in range(1, C):
        s = s + es[c]

    # Hoisted softmax denominator; tail mask folded in so invalid pixels
    # contribute nothing to either intersection or union.
    inv = (valid_f / s) if need_mask else (1.0 / s)         # (BR, 128)

    for c in range(C):
        pm = es[c] * inv                                    # masked softmax prob
        match = (t == c).astype(jnp.float32)                # one-hot slab (scalar cmp)
        inter_acc[c, :] += jnp.sum(pm * match, axis=0)      # (128,)
        union_acc[c, :] += jnp.sum(pm, axis=0) + jnp.sum(match, axis=0)

    @pl.when(c_idx == n_chunks - 1)
    def _():
        inter = jnp.sum(inter_acc[...], axis=-1, keepdims=True)   # (C, 1)
        union = jnp.sum(union_acc[...], axis=-1, keepdims=True)   # (C, 1)
        dice = (2.0 * inter + smooth) / (union + smooth)
        sample_loss = jnp.sum(1.0 - dice)
        out_ref[...] = jnp.broadcast_to(sample_loss, (1, 1, 128)).astype(out_ref.dtype)


def _pick_block_rows(num_rows, C, itemsize,
                     budget_bytes=20 * 1024 * 1024, row_cap=2048):
    """Rows per chunk from the real f32 working set, not the raw DMA block."""
    row_bytes = 128 * (2 * C * itemsize    # double-buffered logits block
                       + 4 * C             # one live C-sized f32 tensor (exp slabs)
                       + 2 * 4             # double-buffered int32 targets
                       + 8 * 4)            # handful of (rows,128) f32 temporaries
    max_rows = budget_bytes // row_bytes
    max_rows = max(8, min(row_cap, (max_rows // 8) * 8))
    if num_rows <= max_rows:
        return num_rows                    # single chunk; "equal full dim" is legal
    return max_rows                        # multiple of 8; last block may be ragged


def dice_loss(inputs, targets, smooth=1.0):
    """inputs: (N, C, H, W) float logits; targets: (N, H, W) int class ids."""
    N, C, H, W = inputs.shape
    HW = H * W
    num_rows = -(-HW // 128)               # ceil(HW / 128)
    hw_pad = num_rows * 128

    x = inputs.reshape(N, C, HW)
    t = targets.reshape(N, HW).astype(jnp.int32)
    if hw_pad != HW:
        # Only for non-128-aligned H*W; aligned sizes are a free reshape (no
        # HBM round trip).  Pad only to the next 128 multiple, never to a
        # block multiple.
        x = jnp.pad(x, ((0, 0), (0, 0), (0, hw_pad - HW)))
        t = jnp.pad(t, ((0, 0), (0, hw_pad - HW)), constant_values=-1)
    x = x.reshape(N, C, num_rows, 128)
    t = t.reshape(N, num_rows, 128)

    itemsize = jnp.dtype(inputs.dtype).itemsize
    block_rows = _pick_block_rows(num_rows, C, itemsize)
    num_chunks = -(-num_rows // block_rows)
    need_mask = (hw_pad != HW) or (num_rows % block_rows != 0)

    kernel = functools.partial(_dice_kernel, smooth=float(smooth),
                               hw_valid=HW, need_mask=need_mask)

    out = pl.pallas_call(
        kernel,
        out_shape=jax.ShapeDtypeStruct((N, 1, 128), jnp.float32),
        grid=(N, num_chunks),
        in_specs=[
            pl.BlockSpec((1, C, block_rows, 128), lambda n, c: (n, 0, c, 0)),
            pl.BlockSpec((1, block_rows, 128), lambda n, c: (n, c, 0)),
        ],
        out_specs=pl.BlockSpec((1, 1, 128), lambda n, c: (n, 0, 0)),
        scratch_shapes=[
            pltpu.VMEM((C, 128), jnp.float32),   # intersection partials
            pltpu.VMEM((C, 128), jnp.float32),   # union partials
        ],
        compiler_params=pltpu.CompilerParams(
            # Per-sample outputs -> batch axis shards across TensorCores;
            # spatial chunk axis is the scratch-accumulated reduction.
            dimension_semantics=("parallel", "arbitrary"),
            vmem_limit_bytes=40 * 1024 * 1024,
        ),
    )(x, t)

    # out[n, 0, :] is sum_c(1 - dice_{n,c}) splat across lanes; finish the
    # mean over (N, C) in plain JAX.
    return jnp.sum(out[:, 0, 0]) / (N * C)


def dice_loss_ref(inputs, targets, smooth=1.0):
    """Pure-JAX reference mirroring the PyTorch module."""
    num_classes = inputs.shape[1]
    onehot = jax.nn.one_hot(targets, num_classes, dtype=jnp.float32)  # (N,H,W,C)
    onehot = jnp.transpose(onehot, (0, 3, 1, 2))                      # (N,C,H,W)
    probs = jax.nn.softmax(inputs.astype(jnp.float32), axis=1)
    inter = jnp.sum(probs * onehot, axis=(2, 3))
    union = jnp.sum(probs, axis=(2, 3)) + jnp.sum(onehot, axis=(2, 3))
    dice = (2.0 * inter + smooth) / (union + smooth)
    return jnp.mean(1.0 - dice)


if __name__ == "__main__":
    key = jax.random.PRNGKey(0)
    k1, k2, k3, k4 = jax.random.split(key, 4)

    # Case 1: lane-aligned spatial size (no pad, no mask path).
    N, C, H, W = 2, 4, 16, 16
    inputs = jax.random.normal(k1, (N, C, H, W), dtype=jnp.float32)
    targets = jax.random.randint(k2, (N, H, W), 0, C, dtype=jnp.int32)
    loss = jax.block_until_ready(dice_loss(inputs, targets, smooth=1.0))
    ref = jax.block_until_ready(dice_loss_ref(inputs, targets, smooth=1.0))
    assert jnp.allclose(loss, ref, atol=1e-5, rtol=1e-5), (loss, ref)

    # Case 2: non-128-multiple spatial size exercises the pad/mask path.
    N2, C2, H2, W2 = 2, 3, 13, 13
    inputs2 = jax.random.normal(k3, (N2, C2, H2, W2), dtype=jnp.float32)
    targets2 = jax.random.randint(k4, (N2, H2, W2), 0, C2, dtype=jnp.int32)
    loss2 = jax.block_until_ready(dice_loss(inputs2, targets2, smooth=1.0))
    ref2 = jax.block_until_ready(dice_loss_ref(inputs2, targets2, smooth=1.0))
    assert jnp.allclose(loss2, ref2, atol=1e-5, rtol=1e-5), (loss2, ref2)

    print("KERNEL_OK")
</pallas_src>

<mosaic_0001>
module attributes {stable_mosaic.version = 11 : i64} {
  func.func @_dice_kernel(%arg0: i32, %arg1: i32, %arg2: memref<1x4x2x128xf32, #tpu.memory_space<vmem>>, %arg3: memref<1x2x128xi32, #tpu.memory_space<vmem>>, %arg4: memref<1x1x128xf32, #tpu.memory_space<vmem>>, %arg5: memref<4x128xf32, #tpu.memory_space<vmem>>, %arg6: memref<4x128xf32, #tpu.memory_space<vmem>>) attributes {dimension_semantics = [#tpu.dimension_semantics<parallel>, #tpu.dimension_semantics<arbitrary>], iteration_bounds = array<i64: 2, 1>, scalar_prefetch = 0 : i64, scratch_operands = 2 : i64, tpu.core_type = #tpu.core_type<tc>, window_params = [{transform_indices = @transform_0, window_bounds = array<i64: 1, 4, 2, 128>}, {transform_indices = @transform_1, window_bounds = array<i64: 1, 2, 128>}, {transform_indices = @transform_2, window_bounds = array<i64: 1, 1, 128>}]} {
    %c0_i32 = arith.constant 0 : i32
    %0 = arith.cmpi eq, %arg1, %c0_i32 : i32
    %1 = arith.extui %0 : i1 to i32
    %c0_i32_0 = arith.constant 0 : i32
    %2 = arith.cmpi ne, %1, %c0_i32_0 : i32
    scf.if %2 {
      %cst_63 = arith.constant 0.000000e+00 : f32
      %120 = vector.broadcast %cst_63 : f32 to vector<4x128xf32>
      %c0_64 = arith.constant 0 : index
      %c0_65 = arith.constant 0 : index
      %121 = vector.load %arg5[%c0_64, %c0_65] : memref<4x128xf32, #tpu.memory_space<vmem>>, vector<4x128xf32>
      tpu.vector_store %arg5[%c0_64, %c0_65], %120 {strides = array<i32>} : memref<4x128xf32, #tpu.memory_space<vmem>>, vector<4x128xf32>,
      %cst_66 = arith.constant 0.000000e+00 : f32
      %122 = vector.broadcast %cst_66 : f32 to vector<4x128xf32>
      %c0_67 = arith.constant 0 : index
      %c0_68 = arith.constant 0 : index
      %123 = vector.load %arg6[%c0_67, %c0_68] : memref<4x128xf32, #tpu.memory_space<vmem>>, vector<4x128xf32>
      tpu.vector_store %arg6[%c0_67, %c0_68], %122 {strides = array<i32>} : memref<4x128xf32, #tpu.memory_space<vmem>>, vector<4x128xf32>,
    } else {
    }
    %c0 = arith.constant 0 : index
    %c0_1 = arith.constant 0 : index
    %c0_2 = arith.constant 0 : index
    %3 = vector.load %arg3[%c0, %c0_1, %c0_2] : memref<1x2x128xi32, #tpu.memory_space<vmem>>, vector<1x2x128xi32>
    %4 = vector.shape_cast %3 : vector<1x2x128xi32> to vector<2x128xi32>
    %c0_3 = arith.constant 0 : index
    %c0_4 = arith.constant 0 : index
    %c0_5 = arith.constant 0 : index
    %c0_6 = arith.constant 0 : index
    %5 = vector.load %arg2[%c0_3, %c0_4, %c0_5, %c0_6] : memref<1x4x2x128xf32, #tpu.memory_space<vmem>>, vector<1x1x2x128xf32>
    %6 = vector.shape_cast %5 : vector<1x1x2x128xf32> to vector<2x128xf32>
    %c0_7 = arith.constant 0 : index
    %c1 = arith.constant 1 : index
    %c0_8 = arith.constant 0 : index
    %c0_9 = arith.constant 0 : index
    %7 = vector.load %arg2[%c0_7, %c1, %c0_8, %c0_9] : memref<1x4x2x128xf32, #tpu.memory_space<vmem>>, vector<1x1x2x128xf32>
    %8 = vector.shape_cast %7 : vector<1x1x2x128xf32> to vector<2x128xf32>
    %c0_10 = arith.constant 0 : index
    %c2 = arith.constant 2 : index
    %c0_11 = arith.constant 0 : index
    %c0_12 = arith.constant 0 : index
    %9 = vector.load %arg2[%c0_10, %c2, %c0_11, %c0_12] : memref<1x4x2x128xf32, #tpu.memory_space<vmem>>, vector<1x1x2x128xf32>
    %10 = vector.shape_cast %9 : vector<1x1x2x128xf32> to vector<2x128xf32>
    %c0_13 = arith.constant 0 : index
    %c3 = arith.constant 3 : index
    %c0_14 = arith.constant 0 : index
    %c0_15 = arith.constant 0 : index
    %11 = vector.load %arg2[%c0_13, %c3, %c0_14, %c0_15] : memref<1x4x2x128xf32, #tpu.memory_space<vmem>>, vector<1x1x2x128xf32>
    %12 = vector.shape_cast %11 : vector<1x1x2x128xf32> to vector<2x128xf32>
    %13 = arith.maximumf %6, %8 : vector<2x128xf32>
    %14 = arith.maximumf %13, %10 : vector<2x128xf32>
    %15 = arith.maximumf %14, %12 : vector<2x128xf32>
    %16 = arith.subf %6, %15 : vector<2x128xf32>
    %17 = math.exp %16 : vector<2x128xf32>
    %18 = arith.subf %8, %15 : vector<2x128xf32>
    %19 = math.exp %18 : vector<2x128xf32>
    %20 = arith.subf %10, %15 : vector<2x128xf32>
    %21 = math.exp %20 : vector<2x128xf32>
    %22 = arith.subf %12, %15 : vector<2x128xf32>
    %23 = math.exp %22 : vector<2x128xf32>
    %24 = arith.addf %17, %19 : vector<2x128xf32>
    %25 = arith.addf %24, %21 : vector<2x128xf32>
    %26 = arith.addf %25, %23 : vector<2x128xf32>
    %cst = arith.constant 1.000000e+00 : f32
    %27 = vector.broadcast %cst : f32 to vector<2x128xf32>
    %28 = arith.divf %27, %26 : vector<2x128xf32>
    %29 = arith.mulf %17, %28 : vector<2x128xf32>
    %c0_i32_16 = arith.constant 0 : i32
    %30 = vector.broadcast %c0_i32_16 : i32 to vector<2x128xi32>
    %31 = arith.cmpi eq, %4, %30 : vector<2x128xi32>
    %32 = arith.extui %31 : vector<2x128xi1> to vector<2x128xi32>
    %33 = arith.sitofp %32 : vector<2x128xi32> to vector<2x128xf32>
    %c0_17 = arith.constant 0 : index
    %c0_18 = arith.constant 0 : index
    %34 = vector.load %arg5[%c0_17, %c0_18] : memref<4x128xf32, #tpu.memory_space<vmem>>, vector<1x128xf32>
    %35 = vector.shape_cast %34 : vector<1x128xf32> to vector<128xf32>
    %36 = arith.mulf %29, %33 : vector<2x128xf32>
    %cst_19 = arith.constant dense<0.000000e+00> : vector<128xf32>
    %37 = vector.multi_reduction <add>, %36, %cst_19 [0] : vector<2x128xf32> to vector<128xf32>
    %38 = arith.addf %35, %37 : vector<128xf32>
    %c0_20 = arith.constant 0 : index
    %c0_21 = arith.constant 0 : index
    %39 = vector.load %arg5[%c0_20, %c0_21] : memref<4x128xf32, #tpu.memory_space<vmem>>, vector<1x128xf32>
    %40 = vector.shape_cast %39 : vector<1x128xf32> to vector<128xf32>
    %41 = vector.shape_cast %38 : vector<128xf32> to vector<1x128xf32>
    tpu.vector_store %arg5[%c0_20, %c0_21], %41 {strides = array<i32>} : memref<4x128xf32, #tpu.memory_space<vmem>>, vector<1x128xf32>,
    %c0_22 = arith.constant 0 : index
    %c0_23 = arith.constant 0 : index
    %42 = vector.load %arg6[%c0_22, %c0_23] : memref<4x128xf32, #tpu.memory_space<vmem>>, vector<1x128xf32>
    %43 = vector.shape_cast %42 : vector<1x128xf32> to vector<128xf32>
    %cst_24 = arith.constant dense<0.000000e+00> : vector<128xf32>
    %44 = vector.multi_reduction <add>, %29, %cst_24 [0] : vector<2x128xf32> to vector<128xf32>
    %cst_25 = arith.constant dense<0.000000e+00> : vector<128xf32>
    %45 = vector.multi_reduction <add>, %33, %cst_25 [0] : vector<2x128xf32> to vector<128xf32>
    %46 = arith.addf %44, %45 : vector<128xf32>
    %47 = arith.addf %43, %46 : vector<128xf32>
    %c0_26 = arith.constant 0 : index
    %c0_27 = arith.constant 0 : index
    %48 = vector.load %arg6[%c0_26, %c0_27] : memref<4x128xf32, #tpu.memory_space<vmem>>, vector<1x128xf32>
    %49 = vector.shape_cast %48 : vector<1x128xf32> to vector<128xf32>
    %50 = vector.shape_cast %47 : vector<128xf32> to vector<1x128xf32>
    tpu.vector_store %arg6[%c0_26, %c0_27], %50 {strides = array<i32>} : memref<4x128xf32, #tpu.memory_space<vmem>>, vector<1x128xf32>,
    %51 = arith.mulf %19, %28 : vector<2x128xf32>
    %c1_i32 = arith.constant 1 : i32
    %52 = vector.broadcast %c1_i32 : i32 to vector<2x128xi32>
    %53 = arith.cmpi eq, %4, %52 : vector<2x128xi32>
    %54 = arith.extui %53 : vector<2x128xi1> to vector<2x128xi32>
    %55 = arith.sitofp %54 : vector<2x128xi32> to vector<2x128xf32>
    %c1_28 = arith.constant 1 : index
    %c0_29 = arith.constant 0 : index
    %56 = vector.load %arg5[%c1_28, %c0_29] : memref<4x128xf32, #tpu.memory_space<vmem>>, vector<1x128xf32>
    %57 = vector.shape_cast %56 : vector<1x128xf32> to vector<128xf32>
    %58 = arith.mulf %51, %55 : vector<2x128xf32>
    %cst_30 = arith.constant dense<0.000000e+00> : vector<128xf32>
    %59 = vector.multi_reduction <add>, %58, %cst_30 [0] : vector<2x128xf32> to vector<128xf32>
    %60 = arith.addf %57, %59 : vector<128xf32>
    %c1_31 = arith.constant 1 : index
    %c0_32 = arith.constant 0 : index
    %61 = vector.load %arg5[%c1_31, %c0_32] : memref<4x128xf32, #tpu.memory_space<vmem>>, vector<1x128xf32>
    %62 = vector.shape_cast %61 : vector<1x128xf32> to vector<128xf32>
    %63 = vector.shape_cast %60 : vector<128xf32> to vector<1x128xf32>
    tpu.vector_store %arg5[%c1_31, %c0_32], %63 {strides = array<i32>} : memref<4x128xf32, #tpu.memory_space<vmem>>, vector<1x128xf32>,
    %c1_33 = arith.constant 1 : index
    %c0_34 = arith.constant 0 : index
    %64 = vector.load %arg6[%c1_33, %c0_34] : memref<4x128xf32, #tpu.memory_space<vmem>>, vector<1x128xf32>
    %65 = vector.shape_cast %64 : vector<1x128xf32> to vector<128xf32>
    %cst_35 = arith.constant dense<0.000000e+00> : vector<128xf32>
    %66 = vector.multi_reduction <add>, %51, %cst_35 [0] : vector<2x128xf32> to vector<128xf32>
    %cst_36 = arith.constant dense<0.000000e+00> : vector<128xf32>
    %67 = vector.multi_reduction <add>, %55, %cst_36 [0] : vector<2x128xf32> to vector<128xf32>
    %68 = arith.addf %66, %67 : vector<128xf32>
    %69 = arith.addf %65, %68 : vector<128xf32>
    %c1_37 = arith.constant 1 : index
    %c0_38 = arith.constant 0 : index
    %70 = vector.load %arg6[%c1_37, %c0_38] : memref<4x128xf32, #tpu.memory_space<vmem>>, vector<1x128xf32>
    %71 = vector.shape_cast %70 : vector<1x128xf32> to vector<128xf32>
    %72 = vector.shape_cast %69 : vector<128xf32> to vector<1x128xf32>
    tpu.vector_store %arg6[%c1_37, %c0_38], %72 {strides = array<i32>} : memref<4x128xf32, #tpu.memory_space<vmem>>, vector<1x128xf32>,
    %73 = arith.mulf %21, %28 : vector<2x128xf32>
    %c2_i32 = arith.constant 2 : i32
    %74 = vector.broadcast %c2_i32 : i32 to vector<2x128xi32>
    %75 = arith.cmpi eq, %4, %74 : vector<2x128xi32>
    %76 = arith.extui %75 : vector<2x128xi1> to vector<2x128xi32>
    %77 = arith.sitofp %76 : vector<2x128xi32> to vector<2x128xf32>
    %c2_39 = arith.constant 2 : index
    %c0_40 = arith.constant 0 : index
    %78 = vector.load %arg5[%c2_39, %c0_40] : memref<4x128xf32, #tpu.memory_space<vmem>>, vector<1x128xf32>
    %79 = vector.shape_cast %78 : vector<1x128xf32> to vector<128xf32>
    %80 = arith.mulf %73, %77 : vector<2x128xf32>
    %cst_41 = arith.constant dense<0.000000e+00> : vector<128xf32>
    %81 = vector.multi_reduction <add>, %80, %cst_41 [0] : vector<2x128xf32> to vector<128xf32>
    %82 = arith.addf %79, %81 : vector<128xf32>
    %c2_42 = arith.constant 2 : index
    %c0_43 = arith.constant 0 : index
    %83 = vector.load %arg5[%c2_42, %c0_43] : memref<4x128xf32, #tpu.memory_space<vmem>>, vector<1x128xf32>
    %84 = vector.shape_cast %83 : vector<1x128xf32> to vector<128xf32>
    %85 = vector.shape_cast %82 : vector<128xf32> to vector<1x128xf32>
    tpu.vector_store %arg5[%c2_42, %c0_43], %85 {strides = array<i32>} : memref<4x128xf32, #tpu.memory_space<vmem>>, vector<1x128xf32>,
    %c2_44 = arith.constant 2 : index
    %c0_45 = arith.constant 0 : index
    %86 = vector.load %arg6[%c2_44, %c0_45] : memref<4x128xf32, #tpu.memory_space<vmem>>, vector<1x128xf32>
    %87 = vector.shape_cast %86 : vector<1x128xf32> to vector<128xf32>
    %cst_46 = arith.constant dense<0.000000e+00> : vector<128xf32>
    %88 = vector.multi_reduction <add>, %73, %cst_46 [0] : vector<2x128xf32> to vector<128xf32>
    %cst_47 = arith.constant dense<0.000000e+00> : vector<128xf32>
    %89 = vector.multi_reduction <add>, %77, %cst_47 [0] : vector<2x128xf32> to vector<128xf32>
    %90 = arith.addf %88, %89 : vector<128xf32>
    %91 = arith.addf %87, %90 : vector<128xf32>
    %c2_48 = arith.constant 2 : index
    %c0_49 = arith.constant 0 : index
    %92 = vector.load %arg6[%c2_48, %c0_49] : memref<4x128xf32, #tpu.memory_space<vmem>>, vector<1x128xf32>
    %93 = vector.shape_cast %92 : vector<1x128xf32> to vector<128xf32>
    %94 = vector.shape_cast %91 : vector<128xf32> to vector<1x128xf32>
    tpu.vector_store %arg6[%c2_48, %c0_49], %94 {strides = array<i32>} : memref<4x128xf32, #tpu.memory_space<vmem>>, vector<1x128xf32>,
    %95 = arith.mulf %23, %28 : vector<2x128xf32>
    %c3_i32 = arith.constant 3 : i32
    %96 = vector.broadcast %c3_i32 : i32 to vector<2x128xi32>
    %97 = arith.cmpi eq, %4, %96 : vector<2x128xi32>
    %98 = arith.extui %97 : vector<2x128xi1> to vector<2x128xi32>
    %99 = arith.sitofp %98 : vector<2x128xi32> to vector<2x128xf32>
    %c3_50 = arith.constant 3 : index
    %c0_51 = arith.constant 0 : index
    %100 = vector.load %arg5[%c3_50, %c0_51] : memref<4x128xf32, #tpu.memory_space<vmem>>, vector<1x128xf32>
    %101 = vector.shape_cast %100 : vector<1x128xf32> to vector<128xf32>
    %102 = arith.mulf %95, %99 : vector<2x128xf32>
    %cst_52 = arith.constant dense<0.000000e+00> : vector<128xf32>
    %103 = vector.multi_reduction <add>, %102, %cst_52 [0] : vector<2x128xf32> to vector<128xf32>
    %104 = arith.addf %101, %103 : vector<128xf32>
    %c3_53 = arith.constant 3 : index
    %c0_54 = arith.constant 0 : index
    %105 = vector.load %arg5[%c3_53, %c0_54] : memref<4x128xf32, #tpu.memory_space<vmem>>, vector<1x128xf32>
    %106 = vector.shape_cast %105 : vector<1x128xf32> to vector<128xf32>
    %107 = vector.shape_cast %104 : vector<128xf32> to vector<1x128xf32>
    tpu.vector_store %arg5[%c3_53, %c0_54], %107 {strides = array<i32>} : memref<4x128xf32, #tpu.memory_space<vmem>>, vector<1x128xf32>,
    %c3_55 = arith.constant 3 : index
    %c0_56 = arith.constant 0 : index
    %108 = vector.load %arg6[%c3_55, %c0_56] : memref<4x128xf32, #tpu.memory_space<vmem>>, vector<1x128xf32>
    %109 = vector.shape_cast %108 : vector<1x128xf32> to vector<128xf32>
    %cst_57 = arith.constant dense<0.000000e+00> : vector<128xf32>
    %110 = vector.multi_reduction <add>, %95, %cst_57 [0] : vector<2x128xf32> to vector<128xf32>
    %cst_58 = arith.constant dense<0.000000e+00> : vector<128xf32>
    %111 = vector.multi_reduction <add>, %99, %cst_58 [0] : vector<2x128xf32> to vector<128xf32>
    %112 = arith.addf %110, %111 : vector<128xf32>
    %113 = arith.addf %109, %112 : vector<128xf32>
    %c3_59 = arith.constant 3 : index
    %c0_60 = arith.constant 0 : index
    %114 = vector.load %arg6[%c3_59, %c0_60] : memref<4x128xf32, #tpu.memory_space<vmem>>, vector<1x128xf32>
    %115 = vector.shape_cast %114 : vector<1x128xf32> to vector<128xf32>
    %116 = vector.shape_cast %113 : vector<128xf32> to vector<1x128xf32>
    tpu.vector_store %arg6[%c3_59, %c0_60], %116 {strides = array<i32>} : memref<4x128xf32, #tpu.memory_space<vmem>>, vector<1x128xf32>,
    %c0_i32_61 = arith.constant 0 : i32
    %117 = arith.cmpi eq, %arg1, %c0_i32_61 : i32
    %118 = arith.extui %117 : i1 to i32
    %c0_i32_62 = arith.constant 0 : i32
    %119 = arith.cmpi ne, %118, %c0_i32_62 : i32
    scf.if %119 {
      %c0_63 = arith.constant 0 : index
      %c0_64 = arith.constant 0 : index
      %120 = vector.load %arg5[%c0_63, %c0_64] : memref<4x128xf32, #tpu.memory_space<vmem>>, vector<4x128xf32>
      %cst_65 = arith.constant dense<0.000000e+00> : vector<4xf32>
      %121 = vector.multi_reduction <add>, %120, %cst_65 [1] : vector<4x128xf32> to vector<4xf32>
      %122 = vector.shape_cast %121 : vector<4xf32> to vector<4x1xf32>
      %c0_66 = arith.constant 0 : index
      %c0_67 = arith.constant 0 : index
      %123 = vector.load %arg6[%c0_66, %c0_67] : memref<4x128xf32, #tpu.memory_space<vmem>>, vector<4x128xf32>
      %cst_68 = arith.constant dense<0.000000e+00> : vector<4xf32>
      %124 = vector.multi_reduction <add>, %123, %cst_68 [1] : vector<4x128xf32> to vector<4xf32>
      %125 = vector.shape_cast %124 : vector<4xf32> to vector<4x1xf32>
      %cst_69 = arith.constant 2.000000e+00 : f32
      %126 = vector.broadcast %cst_69 : f32 to vector<4x1xf32>
      %127 = arith.mulf %126, %122 : vector<4x1xf32>
      %cst_70 = arith.constant 1.000000e+00 : f32
      %128 = vector.broadcast %cst_70 : f32 to vector<4x1xf32>
      %129 = arith.addf %127, %128 : vector<4x1xf32>
      %cst_71 = arith.constant 1.000000e+00 : f32
      %130 = vector.broadcast %cst_71 : f32 to vector<4x1xf32>
      %131 = arith.addf %125, %130 : vector<4x1xf32>
      %132 = arith.divf %129, %131 : vector<4x1xf32>
      %cst_72 = arith.constant 1.000000e+00 : f32
      %133 = vector.broadcast %cst_72 : f32 to vector<4x1xf32>
      %134 = arith.subf %133, %132 : vector<4x1xf32>
      %135 = vector.shape_cast %134 : vector<4x1xf32> to vector<1x4x1xf32>
      %cst_73 = arith.constant dense<0.000000e+00> : vector<1xf32>
      %136 = vector.multi_reduction <add>, %135, %cst_73 [1, 2] : vector<1x4x1xf32> to vector<1xf32>
      %137 = vector.shape_cast %136 : vector<1xf32> to vector<1x1x1xf32>
      %138 = vector.extract %137[0, 0, 0] : f32 from vector<1x1x1xf32>
      %139 = vector.broadcast %138 : f32 to vector<1x1x128xf32>
      %c0_74 = arith.constant 0 : index
      %c0_75 = arith.constant 0 : index
      %c0_76 = arith.constant 0 : index
      %140 = vector.load %arg4[%c0_74, %c0_75, %c0_76] : memref<1x1x128xf32, #tpu.memory_space<vmem>>, vector<1x1x128xf32>
      tpu.vector_store %arg4[%c0_74, %c0_75, %c0_76], %139 {strides = array<i32>} : memref<1x1x128xf32, #tpu.memory_space<vmem>>, vector<1x1x128xf32>,
    } else {
    }
    return
  }
  func.func @transform_0(%arg0: i32, %arg1: i32) -> (i32, i32, i32, i32) {
    %c0_i32 = arith.constant 0 : i32
    %c0_i32_0 = arith.constant 0 : i32
    %c0_i32_1 = arith.constant 0 : i32
    return %arg0, %c0_i32, %arg1, %c0_i32_0 : i32, i32, i32, i32
  }
  func.func @transform_1(%arg0: i32, %arg1: i32) -> (i32, i32, i32) {
    %c0_i32 = arith.constant 0 : i32
    %c0_i32_0 = arith.constant 0 : i32
    return %arg0, %arg1, %c0_i32 : i32, i32, i32
  }
  func.func @transform_2(%arg0: i32, %arg1: i32) -> (i32, i32, i32) {
    %c0_i32 = arith.constant 0 : i32
    %c0_i32_0 = arith.constant 0 : i32
    %c0_i32_1 = arith.constant 0 : i32
    return %arg0, %c0_i32, %c0_i32_0 : i32, i32, i32
  }
}

</mosaic_0001>

<bundles_post_ra>
// kernel: tpu_custom_call.1
= control target key start
LH: loop header
LB: loop body
LE: loop exit
PB: predicated region body
PF: predicated region fallthrough
CT: control target
= control target key end

     0   :  { %7 = vsyncpa [#allocation5], 0  ;;  %s1031_s0 = inlined_call_operand.hbm [shape: f32[2,4,2,128], index: 0, kind: input, shape index: {}]   ;;  %s1032_s1 = inlined_call_operand.hbm [shape: s32[2,2,128], index: 1, kind: input, shape index: {}]   ;;  %s1033_s2 = inlined_call_operand.hbm [shape: f32[2,1,128], index: 2, kind: output, shape index: {}]  }
   0x1   :  { %9 = vsyncpa [#allocation5 + $0x1], 0 }
   0x2   :  { %10 = vsyncpa [#allocation8], 0 }
   0x3   :  { %12 = vsyncpa [#allocation8 + $0x1], 0 }
   0x4   :  { %13 = vsyncpa [#allocation6], 0 }
   0x5   :  { %15 = vsyncpa [#allocation6 + $0x1], 0  ;;  %s803_s9 = smov 0   ;;  %s805_s10 = smov 0  }
   0x6   :  { %s807_s11 = smov 0   ;;  %s809_s12 = smov 0  }
   0x7   :  { %s811_s13 = smov 0   ;;  %s813_s14 = smov 0  }
   0x8 LB: > { %s527_s15 = sadd.s32 4294967295, %s780_s14   ;;  %s528_s16 = sadd.s32 4294967294, %s780_s14   ;;  %s780_s14 = sphi %s813_s14, %s21_s14   ;;  %s776_s13 = sphi %s811_s13, %s1052_s13   ;;  %s772_s12 = sphi %s809_s12, %s1051_s12   ;;  %s768_s11 = sphi %s807_s11, %s1050_s11   ;;  %s764_s10 = sphi %s805_s10, %s1049_s10   ;;  %s760_s9 = sphi %s803_s9, %s1048_s9  }
   0x9   : > { %s33_s17 = sadd.s32 1, %s776_s13  ;;  %s42_s18 = sadd.s32 1, %s768_s11 }
   0xa   : > { %p35_p0 = scmp.ge.s32.totalorder %s33_s17, 2  ;;  %p49_p1 = scmp.ne.s32.totalorder %s768_s11, %s764_s10 }
   0xb   : > { %p50_p2 = scmp.eq.s32.totalorder %s780_s14, 0  ;;  %p55_p3 = scmp.ne.s32.totalorder %s764_s10, %s760_s9 }
   0xc   : > { %s1054_s17 = smov (%p35_p0, %s33_s17), 0  ;;  %p56_p5 = scmp.eq.s32.totalorder %s527_s15, 0 }
   0xd   : > { %p844_p4 = por %p50_p2, %p49_p1  ;;  %s37_s20 = ssub.s32 %s776_s13, %s1054_s17 }
   0xe   : > { %p107_p6 = scmp.eq.s32.totalorder %s527_s15, 1  ;;  %p40_p7 = scmp.eq.s32.totalorder %s37_s20, 0 }
   0xf   : > { %p850_p8 = por %p56_p5, %p55_p3  ;;  %p113_p10 = scmp.eq.s32.totalorder %s528_s16, 1 }
  0x10   : > { %p854_p9 = por %p107_p6, %p49_p1  ;;  %p569_p13 = scmp.lt.s32.totalorder %s780_s14, 2 }
  0x11   : > { %s1037_s21 = scalar_select %p850_p8, 1, 0 }
  0x12   : > { %s1038_s22 = scalar_select %p854_p9, 1, 0 }
  0x13   : > { %s859_s23 = scalar_select %p40_p7, %s768_s11, %s42_s18  }
  0x14   : > { %p861_p11 = por %p113_p10, %p55_p3  ;;  %s868_s25 = sand.u32 1, %s768_s11  }
  0x15   : > { %s531_s26 = sshll.u32 %s868_s25, 3  ;;  %s549_s27 = sshll.u32 %s776_s13, 7 }
  0x16   : > { %s1039_s24 = scalar_select %p861_p11, 1, 0 }
  0x17   : > { %s875_s30 = scalar_lea.hbm %s1031_s0, %s549_s27  ;;  %s137_s3 = scalar_lea.vmem [#allocation4], %s531_s26 }
  0x18   : > { %s145_s4 = sshll.u32 %s137_s3, 4  ;;  %p881_p0 = pnand %p569_p13, %p844_p4  ;;  %s877_s4 = int_to_ptr.vmem [resolvable:$true] %s145_s4 }
  0x19   : > { %s134_s6 = scalar_lea.sflag [#allocation5], %s868_s25  ;;  %s634_s7 = scalar_lea.hbm %s875_s30, 128 }
  0x1a   : > { %p635_p2 = scmp.ne.s32.totalorder %s875_s30, %s634_s7  ;;  %p636_p3 = pneg %p881_p0 }
  0x1b   : > { %s639_s16 = scalar_lea.hbm %s1031_s0, 256  ;;  %p640_p4 = scmp.lt.u32.totalorder %s875_s30, %s1031_s0 }
  0x1c   : > { %p637_p5 = pnand %p636_p3, %p635_p2  ;;  %p641_p7 = scmp.lt.u32.totalorder %s639_s16, %s634_s7 }
  0x1d   : > { %p643_p13 = scmp.lt.u32.totalorder %s634_s7, %s875_s30 }
  0x1e   : > { %p638_p6 = pneg %p637_p5  ;;  %p642_p10 = por %p641_p7, %p640_p4 }
  0x20   : > { %p644_p12 = por %p643_p13, %p642_p10 }
  0x22   : > { %p645_p1 = pnand %p644_p12, %p638_p6 }
  0x24   : > { %648 = shalt.err (!%p645_p1)
}
  0x25   : > { %s649_s20 = scalar_lea.vmem %s877_s4, 128  ;;  %s782_s26 = smov [#allocation4]  }
  0x26   : > { %p650_p2 = scmp.ne.s32.totalorder %s877_s4, %s649_s20  ;;  %s654_s27 = sshll.u32 %s782_s26, 4  ;;  %s655_s27 = int_to_ptr.vmem [resolvable:$false] %s654_s27 }
  0x27   : > { %s656_s28 = scalar_lea.vmem %s655_s27, 256  ;;  %p657_p9 = scmp.lt.s32.totalorder %s877_s4, %s655_s27 }
  0x28   : > { %p652_p5 = pnand %p650_p2, %p636_p3  ;;  %p658_p4 = scmp.lt.s32.totalorder %s656_s28, %s649_s20 }
  0x2a   : > { %p653_p11 = pneg %p652_p5  ;;  %p659_p7 = por %p658_p4, %p657_p9 }
  0x2c   : > { %p660_p10 = pnand %p659_p7, %p653_p11 }
  0x2e   : > { %663 = shalt.err (!%p660_p10)
}
  0x2f   : > { %s783_s29 = smov 32   ;;  %s784_s3 = smov 2  }
  0x30   : > { %561 = dma.hbm_to_vmem [thread:$0]  (!%p881_p0), %s875_s30, 128, %s877_s4, %s134_s6, %s783_s29, %s783_s29, %s784_s3  }
  0x31   : > { %p172_p12 = scmp.lt.s32.totalorder %s780_s14, 3  ;;  %s534_s7 = sshll.u32 %s868_s25, 1 }
  0x32   : > { %s535_s8 = sshll.u32 %s776_s13, 5  ;;  %p1041_p9 = scmp.ge.s32.totalorder %s780_s14, 1 }
  0x33   : > { %s926_s19 = scalar_lea.hbm %s1032_s1, %s535_s8  ;;  %s159_s20 = scalar_lea.vmem [#allocation7], %s534_s7 }
  0x34   : > { %p919_p11 = pnand %p1041_p9, %p172_p12  ;;  %s167_s26 = sshll.u32 %s159_s20, 4  ;;  %s168_s26 = int_to_ptr.vmem [resolvable:$true] %s167_s26 }
  0x35   : > { %s156_s30 = scalar_lea.sflag [#allocation8], %s868_s25  ;;  %s664_s4 = scalar_lea.hbm %s926_s19, 32 }
  0x36   : > { %s1042_s15 = scalar_select %p919_p11, 1, 0 }
  0x37   : > { %p665_p1 = scmp.ne.s32.totalorder %s926_s19, %s664_s4  ;;  %s669_s28 = scalar_lea.hbm %s1032_s1, 64 }
  0x38   : > { %p670_p2 = scmp.lt.u32.totalorder %s926_s19, %s1032_s1  ;;  %p671_p5 = scmp.lt.u32.totalorder %s669_s28, %s664_s4 }
  0x39   : > { %p667_p6 = pnand %p665_p1, %p636_p3  ;;  %p673_p7 = scmp.lt.u32.totalorder %s664_s4, %s926_s19 }
  0x3a   : > { %p672_p4 = por %p671_p5, %p670_p2 }
  0x3b   : > { %p668_p13 = pneg %p667_p6 }
  0x3c   : > { %p674_p10 = por %p673_p7, %p672_p4 }
  0x3e   : > { %p675_p12 = pnand %p674_p10, %p668_p13 }
  0x40   : > { %678 = shalt.err (!%p675_p12)
}
  0x41   : > { %s679_s25 = scalar_lea.vmem %s168_s26, 32  ;;  %s785_s7 = smov [#allocation7]  }
  0x42   : > { %p680_p9 = scmp.ne.s32.totalorder %s168_s26, %s679_s25  ;;  %s684_s8 = sshll.u32 %s785_s7, 4  ;;  %s685_s8 = int_to_ptr.vmem [resolvable:$false] %s684_s8 }
  0x43   : > { %s686_s16 = scalar_lea.vmem %s685_s8, 64  ;;  %p687_p8 = scmp.lt.s32.totalorder %s168_s26, %s685_s8 }
  0x44   : > { %p682_p1 = pnand %p680_p9, %p636_p3  ;;  %p688_p11 = scmp.lt.s32.totalorder %s686_s16, %s679_s25 }
  0x46   : > { %p683_p6 = pneg %p682_p1  ;;  %p689_p2 = por %p688_p11, %p687_p8 }
  0x48   : > { %p690_p5 = pnand %p689_p2, %p683_p6 }
  0x4a   : > { %693 = shalt.err (!%p690_p5)
}
  0x4b   : > { %564 = dma.hbm_to_vmem [thread:$0]  (!%p881_p0), %s926_s19, 32, %s168_s26, %s156_s30  }
  0x4c   : > { %p1043_p13 = scmp.ne.s32.totalorder %s1042_s15, 0 }
  0x4d   : > { %s951_s18 = sand.u32 (!%p1043_p13), 1, %s764_s10   ;;  %p1044_p3 = scmp.ne.s32.totalorder (!%p1043_p13), %s1037_s21, 0 }
  0x4e   : > { %176 = sbr.rel (%p1043_p13) target bundleno = 537 (0x219), region = 28  ;;  %s537_s20 = sshll.u32 (!%p1043_p13), %s951_s18, 3 }
  0x4f   : > { %s179_s4 = scalar_lea.sflag (!%p1043_p13), [#allocation5], %s951_s18  ;;  %s182_s6 = scalar_lea.vmem (!%p1043_p13), [#allocation4], %s537_s20 }
  0x55   : > { %747 = dma.done.wait (%p1044_p3), %s179_s4, 128  }
  0x56   : > { %749 = vsyncadd (%p1044_p3), %s179_s4, 4294967168  ;;  %s538_s5 = sshll.u32 %s951_s18, 1  ;;  %s188_s15 = scalar_lea.sflag [#allocation8], %s951_s18 }
  0x57   : > { %s191_s19 = scalar_lea.vmem [#allocation7], %s538_s5 }
  0x58   : > { %751 = dma.done.wait (%p1044_p3), %s188_s15, 32  }
  0x59   : > { %753 = vsyncadd (%p1044_p3), %s188_s15, 4294967264  ;;  %v786_v0 = vmov 0.0   ;;  %v223_v1 = vld [vmem:[%s182_s6] sm:$0x3]  ;;  %v539_v2 = vld [vmem:[%s182_s6 + $0x2] sm:$0x3] }
  0x5a   : > { %221 = vst [vmem:[#allocation3] sm:$0xf] %v786_v0  ;;  %220 = vst [vmem:[#allocation2] sm:$0xf] %v786_v0  ;;  %v540_v3 = vld [vmem:[%s182_s6 + $0x4] sm:$0x3]  ;;  %v230_v4 = vmax.f32 %v223_v1, %v539_v2 }
  0x5b   : > { %v541_v5 = vld [vmem:[%s182_s6 + $0x6] sm:$0x3]  ;;  %v222_v12 = vld [vmem:[%s191_s19] sm:$0x3]  ;;  %vm256_vm4 = vcmask 1041408   ;;  %vm387_vm5 = vcmask 1043456  }
  0x5c   : > { %v231_v6 = vmax.f32 %v230_v4, %v540_v3  ;;  %vm251_vm0 = vcmp.eq.s32.totalorder %v222_v12, 0  ;;  %vm285_vm1 = vcmp.eq.s32.totalorder %v222_v12, 1  ;;  %vm318_vm2 = vcmp.eq.s32.totalorder %v222_v12, 2  ;;  %s215_s21 = scalar_lea.vmem [#allocation9], %s951_s18  ;;  %s546_s30 = sshll.u32 %s772_s12, 4 }
  0x5d   : > { %vm351_vm3 = vcmp.eq.s32.totalorder %v222_v12, 3  ;;  %v542_v17 = vsel %vm251_vm0, 1.0, %v786_v0  ;;  %v543_v18 = vsel %vm285_vm1, 1.0, %v786_v0  ;;  %v544_v19 = vsel %vm318_vm2, 1.0, %v786_v0  ;;  %s427_s26 = sshll.u32 %s215_s21, 4  ;;  %s984_s3 = scalar_lea.hbm %s1033_s2, %s546_s30  ;;  %s979_s26 = int_to_ptr.vmem [resolvable:$true] %s427_s26 }
  0x5e   : > { %v232_v7 = vmax.f32 %v231_v6, %v541_v5  ;;  %v545_v20 = vsel %vm351_vm3, 1.0, %v786_v0  ;;  %v274_v21 = vsel %vm256_vm4, %v542_v17, 0.0  ;;  %v307_v22 = vsel %vm256_vm4, %v543_v18, 0.0  ;;  %s415_s25 = scalar_lea.sflag [#allocation6], %s951_s18  ;;  %s694_s7 = scalar_lea.vmem %s979_s26, 16 }
  0x5f   : > { %v340_v23 = vsel %vm256_vm4, %v544_v19, 0.0  ;;  %v373_v24 = vsel %vm256_vm4, %v545_v20, 0.0  ;;  %v275_v25 = vrot.slane %v274_v21, 4  ;;  %v308_v27 = vrot.slane %v307_v22, 4  ;;  %p695_p8 = scmp.ne.s32.totalorder %s979_s26, %s694_s7  ;;  %p1045_p0 = scmp.ne.s32.totalorder %s1038_s22, 0 }
  0x60   : > { %v233_v8 = vsub.f32 %v223_v1, %v232_v7  ;;  %v236_v9 = vsub.f32 %v539_v2, %v232_v7  ;;  %v239_v10 = vsub.f32 %v540_v3, %v232_v7  ;;  %v242_v11 = vsub.f32 %v541_v5, %v232_v7  ;;  %s787_s12 = smov [#allocation9]  }
  0x61   : > { %v341_v28 = vrot.slane %v340_v23, 4  ;;  %v374_v29 = vrot.slane %v373_v24, 4  ;;  %v276_v34 = vadd.f32 %v275_v25, %v274_v21  ;;  %v309_v36 = vadd.f32 %v308_v27, %v307_v22  ;;  %p696_p11 = pnand %p695_p8, %p1045_p0  ;;  %s698_s8 = sshll.u32 %s787_s12, 4  ;;  %s699_s8 = int_to_ptr.vmem [resolvable:$false] %s698_s8 }
  0x62   : > { %v234_v13 = vmul.f32 1.442695, %v233_v8  ;;  %v237_v14 = vmul.f32 1.442695, %v236_v9  ;;  %v240_v15 = vmul.f32 1.442695, %v239_v10  ;;  %p701_p7 = scmp.lt.s32.totalorder %s979_s26, %s699_s8 }
  0x63   : > { %v243_v16 = vmul.f32 1.442695, %v242_v11  ;;  %v342_v37 = vadd.f32 %v341_v28, %v340_v23  ;;  %v375_v38 = vadd.f32 %v374_v29, %v373_v24  ;;  %v277_v40 = vrot.slane %v276_v34, 2  ;;  %p697_p4 = pneg %p696_p11  ;;  %s700_s16 = scalar_lea.vmem %s699_s8, 32 }
  0x64   : > { %622 = vpow2.f32 %v234_v13  ;;  %v310_v41 = vrot.slane %v309_v36, 2  ;;  %vm401_vm6 = vcmask 3072   ;;  %p702_p10 = scmp.lt.s32.totalorder %s700_s16, %s694_s7 }
  0x65   : > { %624 = vpow2.f32 %v237_v14  ;;  %v343_v42 = vrot.slane %v342_v37, 2  ;;  %v376_v43 = vrot.slane %v375_v38, 2  ;;  %v278_v44 = vadd.f32 %v277_v40, %v276_v34 }
  0x66   : > { %626 = vpow2.f32 %v240_v15  ;;  %v311_v45 = vadd.f32 %v310_v41, %v309_v36  ;;  %v266_v41 = vld [vmem:[#allocation3] sm:$0x1]  ;;  %p703_p12 = por %p702_p10, %p701_p7 }
  0x67   : > { %628 = vpow2.f32 %v243_v16  ;;  %v344_v46 = vadd.f32 %v343_v42, %v342_v37  ;;  %v377_v47 = vadd.f32 %v376_v43, %v375_v38  ;;  %v279_v48 = vrot.slane %v278_v44, 1 }
  0x68   : > { %v312_v49 = vrot.slane %v311_v45, 1  ;;  %p704_p9 = pnand %p703_p12, %p697_p4 }
  0x69   : > { %v345_v50 = vrot.slane %v344_v46, 1  ;;  %v378_v51 = vrot.slane %v377_v47, 1  ;;  %v280_v57 = vadd.f32 %v279_v48, %v278_v44  ;;  %v365_v48 = vld [vmem:[#allocation3 + $0x3] sm:$0x1] }
  0x6a   : > { %v313_v58 = vadd.f32 %v312_v49, %v311_v45 }
  0x6b   : > { %v346_v59 = vadd.f32 %v345_v50, %v344_v46  ;;  %v379_v60 = vadd.f32 %v378_v51, %v377_v47  ;;  %v299_v46 = vld [vmem:[#allocation3 + $0x1] sm:$0x1]  ;;  %v332_v47 = vld [vmem:[#allocation3 + $0x2] sm:$0x1] }
  0x6e   : > { %v623_v26 = vpop.eup %622 }
  0x6f   : > { %v625_v30 = vpop.eup %624 }
  0x70   : > { %v627_v31 = vpop.eup %626  ;;  %v245_v32 = vadd.f32 %v625_v30, %v623_v26 }
  0x71   : > { %v629_v33 = vpop.eup %628 }
  0x72   : > { %v246_v35 = vadd.f32 %v627_v31, %v245_v32 }
  0x74   : > { %v247_v39 = vadd.f32 %v629_v33, %v246_v35 }
  0x76   : > { %630 = vrcp.f32 %v247_v39 }
  0x80   : > { %v631_v52 = vpop.eup %630 }
  0x81   : > { %v250_v53 = vmul.f32 %v631_v52, %v623_v26  ;;  %v284_v54 = vmul.f32 %v631_v52, %v625_v30  ;;  %v317_v55 = vmul.f32 %v631_v52, %v627_v31  ;;  %v350_v56 = vmul.f32 %v631_v52, %v629_v33 }
  0x83   : > { %v267_v61 = vsel %vm256_vm4, %v250_v53, 0.0  ;;  %v300_v62 = vsel %vm256_vm4, %v284_v54, 0.0  ;;  %v333_v63 = vsel %vm256_vm4, %v317_v55, 0.0  ;;  %v366_v0 = vsel %vm256_vm4, %v350_v56, 0.0 }
  0x84   : > { %v268_v1 = vrot.slane %v267_v61, 4  ;;  %v301_v2 = vrot.slane %v300_v62, 4  ;;  %v334_v3 = vrot.slane %v333_v63, 4  ;;  %v367_v4 = vrot.slane %v366_v0, 4 }
  0x85   : > { %v255_v5 = vmul.f32 %v542_v17, %v250_v53  ;;  %v289_v6 = vmul.f32 %v543_v18, %v284_v54  ;;  %v322_v7 = vmul.f32 %v544_v19, %v317_v55  ;;  %v355_v8 = vmul.f32 %v545_v20, %v350_v56 }
  0x86   : > { %v269_v9 = vadd.f32 %v268_v1, %v267_v61  ;;  %v302_v10 = vadd.f32 %v301_v2, %v300_v62  ;;  %v335_v11 = vadd.f32 %v334_v3, %v333_v63  ;;  %v368_v12 = vadd.f32 %v367_v4, %v366_v0  ;;  %v254_v61 = vld [vmem:[#allocation2] sm:$0x1] }
  0x87   : > { %v257_v13 = vsel %vm256_vm4, %v255_v5, 0.0  ;;  %v290_v14 = vsel %vm256_vm4, %v289_v6, 0.0  ;;  %v323_v15 = vsel %vm256_vm4, %v322_v7, 0.0  ;;  %v356_v16 = vsel %vm256_vm4, %v355_v8, 0.0  ;;  %v288_v6 = vld [vmem:[#allocation2 + $0x1] sm:$0x1] }
  0x88   : > { %v270_v21 = vrot.slane %v269_v9, 2  ;;  %v303_v22 = vrot.slane %v302_v10, 2  ;;  %v336_v23 = vrot.slane %v335_v11, 2  ;;  %v369_v24 = vrot.slane %v368_v12, 2  ;;  %v321_v7 = vld [vmem:[#allocation2 + $0x2] sm:$0x1] }
  0x89   : > { %v258_v17 = vrot.slane %v257_v13, 4  ;;  %v291_v18 = vrot.slane %v290_v14, 4  ;;  %v324_v19 = vrot.slane %v323_v15, 4  ;;  %v357_v20 = vrot.slane %v356_v16, 4  ;;  %v354_v8 = vld [vmem:[#allocation2 + $0x3] sm:$0x1] }
  0x8a   : > { %v271_v25 = vadd.f32 %v270_v21, %v269_v9  ;;  %v304_v26 = vadd.f32 %v303_v22, %v302_v10  ;;  %v337_v27 = vadd.f32 %v336_v23, %v335_v11  ;;  %v370_v28 = vadd.f32 %v369_v24, %v368_v12 }
  0x8b   : > { %v259_v29 = vadd.f32 %v258_v17, %v257_v13  ;;  %v292_v30 = vadd.f32 %v291_v18, %v290_v14  ;;  %v325_v31 = vadd.f32 %v324_v19, %v323_v15  ;;  %v358_v32 = vadd.f32 %v357_v20, %v356_v16 }
  0x8c   : > { %v272_v33 = vrot.slane %v271_v25, 1  ;;  %v305_v34 = vrot.slane %v304_v26, 1  ;;  %v338_v35 = vrot.slane %v337_v27, 1  ;;  %v371_v36 = vrot.slane %v370_v28, 1 }
  0x8d   : > { %v260_v37 = vrot.slane %v259_v29, 2  ;;  %v293_v38 = vrot.slane %v292_v30, 2  ;;  %v326_v39 = vrot.slane %v325_v31, 2  ;;  %v359_v40 = vrot.slane %v358_v32, 2 }
  0x8e   : > { %v273_v42 = vadd.f32 %v272_v33, %v271_v25  ;;  %v306_v43 = vadd.f32 %v305_v34, %v304_v26  ;;  %v339_v44 = vadd.f32 %v338_v35, %v337_v27  ;;  %v372_v45 = vadd.f32 %v371_v36, %v370_v28 }
  0x8f   : > { %v261_v49 = vadd.f32 %v260_v37, %v259_v29  ;;  %v294_v50 = vadd.f32 %v293_v38, %v292_v30  ;;  %v327_v51 = vadd.f32 %v326_v39, %v325_v31  ;;  %v360_v52 = vadd.f32 %v359_v40, %v358_v32 }
  0x90   : > { %v281_v53 = vadd.f32 %v280_v57, %v273_v42  ;;  %v314_v54 = vadd.f32 %v313_v58, %v306_v43  ;;  %v347_v55 = vadd.f32 %v346_v59, %v339_v44  ;;  %v380_v56 = vadd.f32 %v379_v60, %v372_v45 }
  0x91   : > { %v262_v62 = vrot.slane %v261_v49, 1  ;;  %v295_v63 = vrot.slane %v294_v50, 1  ;;  %v328_v0 = vrot.slane %v327_v51, 1  ;;  %v361_v1 = vrot.slane %v360_v52, 1 }
  0x92   : > { %v282_v2 = vadd.f32 %v281_v53, %v266_v41  ;;  %v315_v3 = vadd.f32 %v314_v54, %v299_v46  ;;  %v348_v4 = vadd.f32 %v347_v55, %v332_v47  ;;  %v381_v5 = vadd.f32 %v380_v56, %v365_v48 }
  0x93   : > { %v263_v9 = vadd.f32 %v262_v62, %v261_v49  ;;  %v296_v10 = vadd.f32 %v295_v63, %v294_v50  ;;  %v329_v11 = vadd.f32 %v328_v0, %v327_v51  ;;  %v362_v12 = vadd.f32 %v361_v1, %v360_v52 }
  0x94   : > { %283 = vst [vmem:[#allocation3] sm:$0x1] %v282_v2  ;;  %316 = vst [vmem:[#allocation3 + $0x1] sm:$0x1] %v315_v3 }
  0x95   : > { %349 = vst [vmem:[#allocation3 + $0x2] sm:$0x1] %v348_v4  ;;  %382 = vst [vmem:[#allocation3 + $0x3] sm:$0x1] %v381_v5  ;;  %v264_v57 = vadd.f32 %v263_v9, %v254_v61  ;;  %v297_v58 = vadd.f32 %v296_v10, %v288_v6  ;;  %v330_v59 = vadd.f32 %v329_v11, %v321_v7 }
  0x96   : > { %v363_v60 = vadd.f32 %v362_v12, %v354_v8 }
  0x97   : > { %265 = vst [vmem:[#allocation2] sm:$0x1] %v264_v57  ;;  %298 = vst [vmem:[#allocation2 + $0x1] sm:$0x1] %v297_v58 }
  0x98   : > { %331 = vst [vmem:[#allocation2 + $0x2] sm:$0x1] %v330_v59  ;;  %364 = vst [vmem:[#allocation2 + $0x3] sm:$0x1] %v363_v60 }
  0x9c   : > { %v391_v13 = vld [vmem:[#allocation3] sm:$0xf] }
  0x9d   : > { %v392_v14 = vsel %vm387_vm5, %v391_v13, 0.0 }
  0x9e   : > { %393 = vadd.xlane.f32.xlu0 %v392_v14 }
  0x9f   : > { %v386_v15 = vld [vmem:[#allocation2] sm:$0xf] }
  0xa0   : > { %v388_v16 = vsel %vm387_vm5, %v386_v15, 0.0 }
  0xa2   : > { %389 = vadd.xlane.f32.xlu0 %v388_v16 }
 0x12b   : > { %v394_v21 = vpop.xlane.xlu0 %393 }
 0x12c   : > { %v397_v22 = vadd.f32 1.0, %v394_v21 }
 0x12e   : > { %632 = vrcp.f32 %v397_v22 }
 0x12f   : > { %v390_v23 = vpop.xlane.xlu0 %389 }
 0x130   : > { %v395_v24 = vmul.f32 2.0, %v390_v23 }
 0x132   : > { %v396_v17 = vadd.f32 1.0, %v395_v24 }
 0x138   : > { %v633_v18 = vpop.eup %632 }
 0x139   : > { %v399_v19 = vmul.f32 %v633_v18, %v396_v17 }
 0x13b   : > { %v400_v20 = vsub.f32 1.0, %v399_v19 }
 0x13d   : > { %v402_v25 = vsel %vm401_vm6, %v400_v20, 0.0 }
 0x13e   : > { %403 = vadd.xlane.f32.xlu1 %v402_v25 }
 0x1cb   : > { %v404_v26 = vpop.xlane.xlu1 %403 }
 0x1cc   : > { %v405_v27 = vrot.slane %v404_v26, 4 }
 0x1ce   : > { %v406_v28 = vadd.f32 %v405_v27, %v404_v26 }
 0x1d0   : > { %v407_v29 = vrot.slane %v406_v28, 2 }
 0x1d2   : > { %v408_v30 = vadd.f32 %v407_v29, %v406_v28 }
 0x1d4   : > { %v409_v31 = vrot.slane %v408_v30, 1 }
 0x1d6   : > { %v410_v32 = vadd.f32 %v409_v31, %v408_v30 }
 0x1d8   : > { %550 = vpush %v410_v32 }
 0x209   : > { %s551_s27 = spop %550 }
 0x20a   : > { %v412_v33 = vstv %s551_s27 }
 0x20b   : > { %413 = vst [vmem:[%s215_s21] sm:$0x1] %v412_v33 }
 0x20c   : > { %707 = shalt.err (!%p704_p9)
}
 0x20d   : > { %s708_s18 = scalar_lea.hbm %s984_s3, 16  ;;  %s712_s6 = scalar_lea.hbm %s1033_s2, 32 }
 0x20e   : > { %p709_p1 = scmp.ne.s32.totalorder %s984_s3, %s708_s18  ;;  %p713_p5 = scmp.lt.u32.totalorder %s984_s3, %s1033_s2 }
 0x20f   : > { %p714_p13 = scmp.lt.u32.totalorder %s712_s6, %s708_s18  ;;  %p716_p8 = scmp.lt.u32.totalorder %s708_s18, %s984_s3 }
 0x210   : > { %p710_p6 = pnand %p709_p1, %p1045_p0 }
 0x211   : > { %p715_p3 = por %p714_p13, %p713_p5 }
 0x212   : > { %p711_p2 = pneg %p710_p6 }
 0x213   : > { %p717_p11 = por %p716_p8, %p715_p3 }
 0x215   : > { %p718_p4 = pnand %p717_p11, %p711_p2 }
 0x217   : > { %721 = shalt.err (!%p718_p4)
}
 0x218   : > { %556 = dma.vmem_to_hbm [thread:$0]  (%p1045_p0), %s979_s26, 16, %s984_s3, %s415_s25  }
 0x219 PF: > { %s439_s19 = sand.u32 1, %s760_s9   ;;  %p1046_p7 = scmp.ne.s32.totalorder %s1039_s24, 0 }
 0x21a   : > { %p1047_p10 = scmp.ge.s32.totalorder %s780_s14, 2  ;;  %s440_s21 = scalar_lea.sflag [#allocation6], %s439_s19 }
 0x21c   : > { %p566_p12 = pnand %p1047_p10, %p1046_p7 }
 0x21e   : > { %755 = dma.done.wait (!%p566_p12), %s440_s21, 16  }
 0x21f   : > { %757 = vsyncadd (!%p566_p12), %s440_s21, 4294967280  ;;  %s21_s14 = sadd.s32 1, %s780_s14   ;;  %s1048_s9 = smov %s764_s10 }
 0x220   : > { %p18_p9 = scmp.ge.s32.totalorder %s21_s14, 4   ;;  %s1049_s10 = smov %s768_s11 }
 0x221   : > { %s1050_s11 = smov %s859_s23  ;;  %s1051_s12 = smov %s776_s13 }
 0x222   : > { %s1052_s13 = smov %s1054_s17  ;;  %20 = sbr.rel (!%p18_p9) target bundleno = 8 (0x8), region = 97 }
 0x229   :  { %444 = vsyncpa [#allocation5], 1 }
 0x22a   :  { %446 = vsyncpa [#allocation5 + $0x1], 1 }
 0x22b   :  { %447 = vsyncpa [#allocation8], 1 }
 0x22c   :  { %449 = vsyncpa [#allocation8 + $0x1], 1 }
 0x22d   :  { %450 = vsyncpa [#allocation6], 1 }
 0x22e   :  { %452 = vsyncpa [#allocation6 + $0x1], 1 }

</bundles_post_ra>
